<compile_context>
chip_gen: v6e
topology: v6e:2x2x1
jax: 0.10.0
libtpu: 0.0.40
codegen_flags: <defaults>
</compile_context>

<pallas_src>
import jax
import jax.numpy as jnp
from jax import lax
from jax.experimental import pallas as pl
from jax.experimental.pallas import tpu as pltpu

H1, H2 = 64, 32  # hidden sizes from the nn.Sequential spec


def mlp_kernel(x_ref, w1t_ref, b1_ref, w2t_ref, b2_ref, w3_ref, b3_ref, o_ref):
    # x_ref: (TILE_B, F) f32 batch tile. Weights are pre-transposed so all
    # contractions are MXU-native and activations carry the batch on lanes:
    #   h1 = W1T(64,F) . x(TILE_B,F)^T  -> (64, TILE_B)
    #   h2 = W2T(32,64) @ h1            -> (32, TILE_B)
    #   z  = sum_k w3[k] * h2[k, :]     -> (1, TILE_B)  (VPU mul + sublane reduce)
    x = x_ref[...].astype(jnp.bfloat16)  # bf16 MXU operands, f32 accumulate

    # Contract both minor dims (the q @ k.T pattern) -> lane-dense (64, TILE_B).
    h1 = lax.dot_general(
        w1t_ref[...], x,
        dimension_numbers=(((1,), (1,)), ((), ())),
        preferred_element_type=jnp.float32,
    ) + b1_ref[...]                       # (64, TILE_B) f32
    h1 = jnp.maximum(h1, 0.0)             # ReLU in f32 (v5e VPU has no bf16)

    h2 = jnp.dot(
        w2t_ref[...], h1.astype(jnp.bfloat16),
        preferred_element_type=jnp.float32,
    ) + b2_ref[...]                       # (32, TILE_B) f32
    h2 = jnp.maximum(h2, 0.0)

    # Final layer has out_features=1: keep it off the MXU. Elementwise multiply
    # (VPU) + reduce over the 32 hidden rows (sublane/XLU); result is already
    # lane-dense so the store is a plain unmasked vst.
    z = jnp.sum(h2 * w3_ref[...], axis=0, keepdims=True) + b3_ref[...]  # (1, TILE_B)
    o_ref[...] = jax.nn.sigmoid(z)


def mlp_forward(x, params, *, tile_b=512):
    """x: (B, input_size) float32 -> (B, 1) float32.

    tile_b: batch rows per grid step (multiple of 128). 512-4096 all fit easily
    (x tile = tile_b*F*4 bytes; even 4096x32 f32 is 512 KiB, well under the
    32 MiB scoped VMEM on v7x even with double buffering), so no
    vmem_limit_bytes override is needed.
    """
    w1, b1, w2, b2, w3, b3 = params
    B, F = x.shape

    # Tiny, VMEM-resident operands: pre-transpose / pre-cast once in the wrapper.
    w1t = w1.T.astype(jnp.bfloat16)            # (64, F)
    w2t = w2.T.astype(jnp.bfloat16)            # (32, 64)
    b1c = b1.reshape(H1, 1).astype(jnp.float32)
    b2c = b2.reshape(H2, 1).astype(jnp.float32)
    w3c = w3.reshape(H2, 1).astype(jnp.float32)
    b3c = b3.reshape(1, 1).astype(jnp.float32)

    # Pad batch up to a whole number of tiles; padded rows are sliced off below.
    grid_b = pl.cdiv(B, tile_b)
    b_pad = grid_b * tile_b
    if b_pad != B:
        x = jnp.pad(x, ((0, b_pad - B), (0, 0)))

    def resident(a):  # full array, same block every grid step -> stays in VMEM
        return pl.BlockSpec(a.shape, lambda i, _nd=a.ndim: (0,) * _nd)

    flops = 2 * b_pad * (F * H1 + H1 * H2 + H2)
    bytes_accessed = (
        x.size * x.dtype.itemsize + b_pad * 4
        + sum(a.size * a.dtype.itemsize for a in (w1t, b1c, w2t, b2c, w3c, b3c))
    )

    out = pl.pallas_call(
        mlp_kernel,
        out_shape=jax.ShapeDtypeStruct((1, b_pad), jnp.float32),  # lane-dense
        grid=(grid_b,),
        in_specs=[
            pl.BlockSpec((tile_b, F), lambda i: (i, 0)),  # streamed batch tile
            resident(w1t), resident(b1c), resident(w2t),
            resident(b2c), resident(w3c), resident(b3c),
        ],
        out_specs=pl.BlockSpec((1, tile_b), lambda i: (0, i)),
        compiler_params=pltpu.CompilerParams(
            dimension_semantics=("parallel",)),
        cost_estimate=pl.CostEstimate(
            flops=flops, transcendentals=b_pad, bytes_accessed=bytes_accessed),
    )(x, w1t, b1c, w2t, b2c, w3c, b3c)

    # (1, B_pad) lane-dense kernel output -> (B, 1) module output.
    return out.reshape(b_pad, 1)[:B]


def init_params(key, input_size):
    """Deterministic init mimicking nn.Linear's U(-1/sqrt(fan_in), 1/sqrt(fan_in))."""
    def linear(key, fan_in, fan_out):
        kw, kb = jax.random.split(key)
        bound = 1.0 / jnp.sqrt(fan_in)
        w = jax.random.uniform(kw, (fan_in, fan_out), jnp.float32, -bound, bound)
        b = jax.random.uniform(kb, (fan_out,), jnp.float32, -bound, bound)
        return w, b

    k1, k2, k3 = jax.random.split(key, 3)
    w1, b1 = linear(k1, input_size, H1)
    w2, b2 = linear(k2, H1, H2)
    w3, b3 = linear(k3, H2, 1)
    return (w1, b1, w2, b2, w3, b3)


def mlp_ref(x, params):
    w1, b1, w2, b2, w3, b3 = params
    h1 = jnp.maximum(x @ w1 + b1, 0.0)
    h2 = jnp.maximum(h1 @ w2 + b2, 0.0)
    return jax.nn.sigmoid(h2 @ w3 + b3)


if __name__ == "__main__":
    key = jax.random.PRNGKey(0)
    kx, kp, kx2 = jax.random.split(key, 3)

    batch, input_size = 8, 32
    x = jax.random.normal(kx, (batch, input_size), jnp.float32)
    params = init_params(kp, input_size)

    out = jax.block_until_ready(mlp_forward(x, params))
    ref = mlp_ref(x, params)
    assert out.shape == (batch, 1), out.shape
    # bf16 matmul operands (f32 accumulation) -> relaxed tolerance vs f32 ref.
    assert jnp.allclose(out, ref, atol=2e-2, rtol=2e-2), jnp.max(jnp.abs(out - ref))

    # Multi-tile path (grid > 1, ragged batch + padding) with a smaller tile.
    batch2 = 1153
    x2 = jax.random.normal(kx2, (batch2, input_size), jnp.float32)
    out2 = jax.block_until_ready(mlp_forward(x2, params, tile_b=256))
    ref2 = mlp_ref(x2, params)
    assert out2.shape == (batch2, 1), out2.shape
    assert jnp.allclose(out2, ref2, atol=2e-2, rtol=2e-2), jnp.max(jnp.abs(out2 - ref2))

    print("KERNEL_OK")
</pallas_src>

<mosaic_0001>
module attributes {stable_mosaic.version = 11 : i64} {
  func.func @mlp_kernel(%arg0: i32, %arg1: memref<512x32xf32, #tpu.memory_space<vmem>>, %arg2: memref<64x32xbf16, #tpu.memory_space<vmem>>, %arg3: memref<64x1xf32, #tpu.memory_space<vmem>>, %arg4: memref<32x64xbf16, #tpu.memory_space<vmem>>, %arg5: memref<32x1xf32, #tpu.memory_space<vmem>>, %arg6: memref<32x1xf32, #tpu.memory_space<vmem>>, %arg7: memref<1x1xf32, #tpu.memory_space<vmem>>, %arg8: memref<1x512xf32, #tpu.memory_space<vmem>>) attributes {dimension_semantics = [#tpu.dimension_semantics<parallel>], iteration_bounds = array<i64: 1>, scalar_prefetch = 0 : i64, scratch_operands = 0 : i64, tpu.core_type = #tpu.core_type<tc>, window_params = [{transform_indices = @transform_0, window_bounds = array<i64: 512, 32>}, {pipeline_mode = #tpu.pipeline_mode<synchronous>, transform_indices = @transform_1, window_bounds = array<i64: 64, 32>}, {pipeline_mode = #tpu.pipeline_mode<synchronous>, transform_indices = @transform_2, window_bounds = array<i64: 64, 1>}, {pipeline_mode = #tpu.pipeline_mode<synchronous>, transform_indices = @transform_3, window_bounds = array<i64: 32, 64>}, {pipeline_mode = #tpu.pipeline_mode<synchronous>, transform_indices = @transform_4, window_bounds = array<i64: 32, 1>}, {pipeline_mode = #tpu.pipeline_mode<synchronous>, transform_indices = @transform_5, window_bounds = array<i64: 32, 1>}, {pipeline_mode = #tpu.pipeline_mode<synchronous>, transform_indices = @transform_6, window_bounds = array<i64: 1, 1>}, {transform_indices = @transform_7, window_bounds = array<i64: 1, 512>}]} {
    %c0 = arith.constant 0 : index
    %c0_0 = arith.constant 0 : index
    %0 = vector.load %arg1[%c0, %c0_0] : memref<512x32xf32, #tpu.memory_space<vmem>>, vector<512x32xf32>
    %1 = arith.truncf %0 : vector<512x32xf32> to vector<512x32xbf16>
    %c0_1 = arith.constant 0 : index
    %c0_2 = arith.constant 0 : index
    %2 = vector.load %arg2[%c0_1, %c0_2] : memref<64x32xbf16, #tpu.memory_space<vmem>>, vector<64x32xbf16>
    %cst = arith.constant dense<0.000000e+00> : vector<64x512xf32>
    %3 = tpu.matmul %2, %1, %cst {dimension_numbers = #tpu.dot_dimension_numbers<[1], [1], [0], [0], [0, 0, 1, 0], [], []>} : vector<64x32xbf16>, vector<512x32xbf16>, vector<64x512xf32> -> vector<64x512xf32>
    %c0_3 = arith.constant 0 : index
    %c0_4 = arith.constant 0 : index
    %4 = vector.load %arg3[%c0_3, %c0_4] : memref<64x1xf32, #tpu.memory_space<vmem>>, vector<64x1xf32>
    %5 = vector.broadcast %4 : vector<64x1xf32> to vector<64x512xf32>
    %6 = arith.addf %3, %5 : vector<64x512xf32>
    %cst_5 = arith.constant 0.000000e+00 : f32
    %7 = vector.broadcast %cst_5 : f32 to vector<64x512xf32>
    %8 = arith.maximumf %6, %7 : vector<64x512xf32>
    %c0_6 = arith.constant 0 : index
    %c0_7 = arith.constant 0 : index
    %9 = vector.load %arg4[%c0_6, %c0_7] : memref<32x64xbf16, #tpu.memory_space<vmem>>, vector<32x64xbf16>
    %10 = arith.truncf %8 : vector<64x512xf32> to vector<64x512xbf16>
    %cst_8 = arith.constant dense<0.000000e+00> : vector<32x512xf32>
    %11 = tpu.matmul %9, %10, %cst_8 {dimension_numbers = #tpu.dot_dimension_numbers<[1], [0], [0], [1], [0, 0, 1, 1], [], []>} : vector<32x64xbf16>, vector<64x512xbf16>, vector<32x512xf32> -> vector<32x512xf32>
    %c0_9 = arith.constant 0 : index
    %c0_10 = arith.constant 0 : index
    %12 = vector.load %arg5[%c0_9, %c0_10] : memref<32x1xf32, #tpu.memory_space<vmem>>, vector<32x1xf32>
    %13 = vector.broadcast %12 : vector<32x1xf32> to vector<32x512xf32>
    %14 = arith.addf %11, %13 : vector<32x512xf32>
    %cst_11 = arith.constant 0.000000e+00 : f32
    %15 = vector.broadcast %cst_11 : f32 to vector<32x512xf32>
    %16 = arith.maximumf %14, %15 : vector<32x512xf32>
    %c0_12 = arith.constant 0 : index
    %c0_13 = arith.constant 0 : index
    %17 = vector.load %arg6[%c0_12, %c0_13] : memref<32x1xf32, #tpu.memory_space<vmem>>, vector<32x1xf32>
    %18 = vector.broadcast %17 : vector<32x1xf32> to vector<32x512xf32>
    %19 = arith.mulf %16, %18 : vector<32x512xf32>
    %cst_14 = arith.constant dense<0.000000e+00> : vector<512xf32>
    %20 = vector.multi_reduction <add>, %19, %cst_14 [0] : vector<32x512xf32> to vector<512xf32>
    %21 = vector.shape_cast %20 : vector<512xf32> to vector<1x512xf32>
    %c0_15 = arith.constant 0 : index
    %c0_16 = arith.constant 0 : index
    %22 = vector.load %arg7[%c0_15, %c0_16] : memref<1x1xf32, #tpu.memory_space<vmem>>, vector<1x1xf32>
    %23 = vector.broadcast %22 : vector<1x1xf32> to vector<1x512xf32>
    %24 = arith.addf %21, %23 : vector<1x512xf32>
    %25 = arith.negf %24 : vector<1x512xf32>
    %26 = math.exp %25 : vector<1x512xf32>
    %cst_17 = arith.constant 1.000000e+00 : f32
    %27 = vector.broadcast %cst_17 : f32 to vector<1x512xf32>
    %28 = arith.addf %27, %26 : vector<1x512xf32>
    %29 = arith.divf %27, %28 : vector<1x512xf32>
    %c0_18 = arith.constant 0 : index
    %c0_19 = arith.constant 0 : index
    %30 = vector.load %arg8[%c0_18, %c0_19] : memref<1x512xf32, #tpu.memory_space<vmem>>, vector<1x512xf32>
    tpu.vector_store %arg8[%c0_18, %c0_19], %29 {strides = array<i32>} : memref<1x512xf32, #tpu.memory_space<vmem>>, vector<1x512xf32>,
    return
  }
  func.func @transform_0(%arg0: i32) -> (i32, i32) {
    %c0_i32 = arith.constant 0 : i32
    %c0_i32_0 = arith.constant 0 : i32
    return %arg0, %c0_i32 : i32, i32
  }
  func.func @transform_1(%arg0: i32) -> (i32, i32) {
    %c0_i32 = arith.constant 0 : i32
    %c0_i32_0 = arith.constant 0 : i32
    %c0_i32_1 = arith.constant 0 : i32
    return %c0_i32, %c0_i32_0 : i32, i32
  }
  func.func @transform_2(%arg0: i32) -> (i32, i32) {
    %c0_i32 = arith.constant 0 : i32
    %c0_i32_0 = arith.constant 0 : i32
    %c0_i32_1 = arith.constant 0 : i32
    return %c0_i32, %c0_i32_0 : i32, i32
  }
  func.func @transform_3(%arg0: i32) -> (i32, i32) {
    %c0_i32 = arith.constant 0 : i32
    %c0_i32_0 = arith.constant 0 : i32
    %c0_i32_1 = arith.constant 0 : i32
    return %c0_i32, %c0_i32_0 : i32, i32
  }
  func.func @transform_4(%arg0: i32) -> (i32, i32) {
    %c0_i32 = arith.constant 0 : i32
    %c0_i32_0 = arith.constant 0 : i32
    %c0_i32_1 = arith.constant 0 : i32
    return %c0_i32, %c0_i32_0 : i32, i32
  }
  func.func @transform_5(%arg0: i32) -> (i32, i32) {
    %c0_i32 = arith.constant 0 : i32
    %c0_i32_0 = arith.constant 0 : i32
    %c0_i32_1 = arith.constant 0 : i32
    return %c0_i32, %c0_i32_0 : i32, i32
  }
  func.func @transform_6(%arg0: i32) -> (i32, i32) {
    %c0_i32 = arith.constant 0 : i32
    %c0_i32_0 = arith.constant 0 : i32
    %c0_i32_1 = arith.constant 0 : i32
    return %c0_i32, %c0_i32_0 : i32, i32
  }
  func.func @transform_7(%arg0: i32) -> (i32, i32) {
    %c0_i32 = arith.constant 0 : i32
    %c0_i32_0 = arith.constant 0 : i32
    return %c0_i32, %arg0 : i32, i32
  }
}

</mosaic_0001>

<bundles_post_ra>
// kernel: tpu_custom_call.1
= control target key start
LH: loop header
LB: loop body
LE: loop exit
PB: predicated region body
PF: predicated region fallthrough
CT: control target
= control target key end

     0   :  { %s1410_s0 = inlined_call_operand.vmem [shape: f32[512,32], index: 0, kind: input, shape index: {}]   ;;  %s1411_s1 = inlined_call_operand.vmem [shape: bf16[64,32], index: 1, kind: input, shape index: {}]   ;;  %s1412_s2 = inlined_call_operand.vmem [shape: f32[64,1], index: 2, kind: input, shape index: {}]   ;;  %s1413_s3 = inlined_call_operand.vmem [shape: bf16[32,64], index: 3, kind: input, shape index: {}]   ;;  %s1414_s4 = inlined_call_operand.vmem [shape: f32[32,1], index: 4, kind: input, shape index: {}]   ;;  %s1415_s5 = inlined_call_operand.vmem [shape: f32[32,1], index: 5, kind: input, shape index: {}]   ;;  %s1416_s6 = inlined_call_operand.<no memory space> [shape: f32[1,1], index: 6, kind: input, shape index: {}]   ;;  %s1417_s7 = inlined_call_operand.hbm [shape: f32[1,512], index: 7, kind: output, shape index: {}]  }
   0x1   :  { %v12_v0 = vstv %s1416_s6 }
   0x2   :  { %13 = vst [vmem:[#allocation2] sm:$0x1] %v12_v0 }
   0x3   :  { %v60_v1 = vld [vmem:[%s1410_s0 + $0xf0] sm:$0xff]  ;;  %v61_v2 = vld [vmem:[%s1410_s0 + $0xf8] sm:$0xff]  ;;  %vm202_vm0 = vcmask 261120   ;;  %v969_v8 = vmov 0   ;;  %v58_v13 = vld [vmem:[%s1410_s0 + $0xe0] sm:$0xff] }
   0x4   :  { %v92_v3 = vld [vmem:[%s1410_s0 + $0x1f0] sm:$0xff]  ;;  %v109_v4 = vpack.c.bf16 %v61_v2, %v60_v1  ;;  %v93_v5 = vld [vmem:[%s1410_s0 + $0x1f8] sm:$0xff]  ;;  %923 = vset.pattern.permute.xlu0 %v969_v8  ;;  %924 = vset.pattern.permute.xlu1 %v969_v8  ;;  %v59_v15 = vld [vmem:[%s1410_s0 + $0xe8] sm:$0xff] }
   0x5   :  { %v44_v6 = vld [vmem:[%s1410_s0 + $0x70] sm:$0xff]  ;;  %v45_v7 = vld [vmem:[%s1410_s0 + $0x78] sm:$0xff]  ;;  %v125_v9 = vpack.c.bf16 %v93_v5, %v92_v3  ;;  %v90_v16 = vld [vmem:[%s1410_s0 + $0x1e0] sm:$0xff]  ;;  %v108_v19 = vpack.c.bf16 %v59_v15, %v58_v13 }
   0x6   :  { %v101_v10 = vpack.c.bf16 %v45_v7, %v44_v6  ;;  %v76_v11 = vld [vmem:[%s1410_s0 + $0x170] sm:$0xff]  ;;  %v77_v12 = vld [vmem:[%s1410_s0 + $0x178] sm:$0xff]  ;;  %904 = vmatprep.subr.msk.bf16.mxu0 %vm202_vm0, %v109_v4  ;;  %v91_v17 = vld [vmem:[%s1410_s0 + $0x1e8] sm:$0xff] }
   0x7   :  { %v117_v14 = vpack.c.bf16 %v77_v12, %v76_v11  ;;  %912 = vmatprep.subr.msk.bf16.mxu1 %vm202_vm0, %v125_v9  ;;  %v124_v20 = vpack.c.bf16 %v91_v17, %v90_v16  ;;  %v42_v21 = vld [vmem:[%s1410_s0 + $0x60] sm:$0xff]  ;;  %v43_v22 = vld [vmem:[%s1410_s0 + $0x68] sm:$0xff]  ;;  %v56_v28 = vld [vmem:[%s1410_s0 + $0xd0] sm:$0xff] }
   0x8   :  { %v237_v18 = vsel %vm202_vm0, %v101_v10, 0  ;;  %v74_v23 = vld [vmem:[%s1410_s0 + $0x160] sm:$0xff]  ;;  %v75_v25 = vld [vmem:[%s1410_s0 + $0x168] sm:$0xff]  ;;  %v100_v26 = vpack.c.bf16 %v43_v22, %v42_v21  ;;  %v57_v29 = vld [vmem:[%s1410_s0 + $0xd8] sm:$0xff] }
   0x9   :  { %857 = vmatpush3.bf16.xpose.msra.mxu0 %v237_v18  ;;  %v285_v24 = vsel %vm202_vm0, %v117_v14, 0  ;;  %v116_v27 = vpack.c.bf16 %v75_v25, %v74_v23  ;;  %v88_v30 = vld [vmem:[%s1410_s0 + $0x1d0] sm:$0xff]  ;;  %v89_v31 = vld [vmem:[%s1410_s0 + $0x1d8] sm:$0xff]  ;;  %v107_v33 = vpack.c.bf16 %v57_v29, %v56_v28  ;;  %v54_v42 = vld [vmem:[%s1410_s0 + $0xc0] sm:$0xff] }
   0xa   :  { %881 = vmatpush3.bf16.xpose.msra.mxu1 %v285_v24  ;;  %905 = vmatprep.subr.msk.bf16.mxu0 %vm202_vm0, %v108_v19  ;;  %v234_v32 = vsel %vm202_vm0, %v100_v26, 0  ;;  %v123_v35 = vpack.c.bf16 %v89_v31, %v88_v30  ;;  %v40_v36 = vld [vmem:[%s1410_s0 + $0x50] sm:$0xff]  ;;  %v41_v37 = vld [vmem:[%s1410_s0 + $0x58] sm:$0xff]  ;;  %v55_v43 = vld [vmem:[%s1410_s0 + $0xc8] sm:$0xff] }
   0xb   :  { %913 = vmatprep.subr.msk.bf16.mxu1 %vm202_vm0, %v124_v20  ;;  %v282_v34 = vsel %vm202_vm0, %v116_v27, 0  ;;  %v72_v38 = vld [vmem:[%s1410_s0 + $0x150] sm:$0xff]  ;;  %v73_v39 = vld [vmem:[%s1410_s0 + $0x158] sm:$0xff]  ;;  %v99_v40 = vpack.c.bf16 %v41_v37, %v40_v36  ;;  %v86_v44 = vld [vmem:[%s1410_s0 + $0x1c0] sm:$0xff]  ;;  %v106_v47 = vpack.c.bf16 %v55_v43, %v54_v42 }
   0xc   :  { %v115_v41 = vpack.c.bf16 %v73_v39, %v72_v38  ;;  %v87_v45 = vld [vmem:[%s1410_s0 + $0x1c8] sm:$0xff]  ;;  %v38_v50 = vld [vmem:[%s1410_s0 + $0x40] sm:$0xff]  ;;  %v52_v54 = vld [vmem:[%s1410_s0 + $0xb0] sm:$0xff] }
   0xd   :  { %v231_v46 = vsel %vm202_vm0, %v99_v40, 0  ;;  %v122_v49 = vpack.c.bf16 %v87_v45, %v86_v44  ;;  %v39_v51 = vld [vmem:[%s1410_s0 + $0x48] sm:$0xff]  ;;  %v70_v52 = vld [vmem:[%s1410_s0 + $0x140] sm:$0xff]  ;;  %v53_v55 = vld [vmem:[%s1410_s0 + $0xb8] sm:$0xff] }
   0xe   :  { %v279_v48 = vsel %vm202_vm0, %v115_v41, 0  ;;  %v71_v53 = vld [vmem:[%s1410_s0 + $0x148] sm:$0xff]  ;;  %v98_v56 = vpack.c.bf16 %v39_v51, %v38_v50  ;;  %v1135_v57 = vld [vmem:[%s1411_s1] sm:$0xff]   ;;  %v84_v59 = vld [vmem:[%s1410_s0 + $0x1b0] sm:$0xff]  ;;  %v105_v63 = vpack.c.bf16 %v53_v55, %v52_v54 }
   0xf   :  { %v114_v58 = vpack.c.bf16 %v71_v53, %v70_v52  ;;  %v85_v60 = vld [vmem:[%s1410_s0 + $0x1b8] sm:$0xff]  ;;  %872 = vmatprep.mubr.msk.bf16.mxu0 %vm202_vm0, %v1135_v57  ;;  %896 = vmatprep.mubr.msk.bf16.mxu1 %vm202_vm0, %v1135_v57  ;;  %v140_v61 = vld [vmem:[%s1412_s2 + $0x30] sm:$0xff]  ;;  %v138_v0 = vld [vmem:[%s1412_s2 + $0x20] sm:$0xff] }
  0x10   :  { %v228_v62 = vsel %vm202_vm0, %v98_v56, 0  ;;  %174 = vperm.xlu0 %923, %v140_v61   ;;  %v121_v2 = vpack.c.bf16 %v85_v60, %v84_v59  ;;  %v36_v3 = vld [vmem:[%s1410_s0 + $0x30] sm:$0xff]  ;;  %v37_v4 = vld [vmem:[%s1410_s0 + $0x38] sm:$0xff]  ;;  %164 = vperm.xlu1 %924, %v138_v0   ;;  %v50_v9 = vld [vmem:[%s1410_s0 + $0xa0] sm:$0xff] }
  0x11   :  { %859 = vmatpush3.bf16.xpose.msra.mxu0 %v234_v32  ;;  %v276_v1 = vsel %vm202_vm0, %v114_v58, 0  ;;  %v68_v5 = vld [vmem:[%s1410_s0 + $0x130] sm:$0xff]  ;;  %v69_v6 = vld [vmem:[%s1410_s0 + $0x138] sm:$0xff]  ;;  %v139_v10 = vld [vmem:[%s1412_s2 + $0x28] sm:$0xff]  ;;  %v97_v11 = vpack.c.bf16 %v37_v4, %v36_v3 }
  0x12   :  { %883 = vmatpush3.bf16.xpose.msra.mxu1 %v282_v34  ;;  %906 = vmatprep.subr.msk.bf16.mxu0 %vm202_vm0, %v107_v33  ;;  %v141_v7 = vld [vmem:[%s1412_s2 + $0x38] sm:$0xff]  ;;  %v51_v12 = vld [vmem:[%s1410_s0 + $0xa8] sm:$0xff]  ;;  %v82_v13 = vld [vmem:[%s1410_s0 + $0x1a0] sm:$0xff]  ;;  %v113_v15 = vpack.c.bf16 %v69_v6, %v68_v5 }
  0x13   :  { %914 = vmatprep.subr.msk.bf16.mxu1 %vm202_vm0, %v123_v35  ;;  %v83_v14 = vld [vmem:[%s1410_s0 + $0x1a8] sm:$0xff]  ;;  %v136_v16 = vld [vmem:[%s1412_s2 + $0x10] sm:$0xff] }
  0x14   :  { %179 = vperm.xlu0 %923, %v141_v7   ;;  %169 = vperm.xlu1 %924, %v139_v10  }
  0x19   :  { %861 = vmatpush3.bf16.xpose.msra.mxu0 %v231_v46 }
  0x1a   :  { %885 = vmatpush3.bf16.xpose.msra.mxu1 %v279_v48  ;;  %907 = vmatprep.subr.msk.bf16.mxu0 %vm202_vm0, %v106_v47 }
  0x1b   :  { %915 = vmatprep.subr.msk.bf16.mxu1 %vm202_vm0, %v122_v49 }
  0x21   :  { %863 = vmatpush3.bf16.xpose.msra.mxu0 %v228_v62 }
  0x22   :  { %887 = vmatpush3.bf16.xpose.msra.mxu1 %v276_v1  ;;  %908 = vmatprep.subr.msk.bf16.mxu0 %vm202_vm0, %v105_v63 }
  0x23   :  { %916 = vmatprep.subr.msk.bf16.mxu1 %vm202_vm0, %v121_v2 }
  0x24   :  { %14 = vsyncpa [#allocation4], 0  ;;  %v137_v17 = vld [vmem:[%s1412_s2 + $0x18] sm:$0xff]  ;;  %v225_v18 = vsel %vm202_vm0, %v97_v11, 0  ;;  %v104_v19 = vpack.c.bf16 %v51_v12, %v50_v9  ;;  %v273_v20 = vsel %vm202_vm0, %v113_v15, 0  ;;  %v120_v21 = vpack.c.bf16 %v83_v14, %v82_v13  ;;  %v34_v22 = vld [vmem:[%s1410_s0 + $0x20] sm:$0xff]  ;;  %154 = vperm.xlu0 %923, %v136_v16  }
  0x25   :  { %v35_v23 = vld [vmem:[%s1410_s0 + $0x28] sm:$0xff]  ;;  %v66_v24 = vld [vmem:[%s1410_s0 + $0x120] sm:$0xff]  ;;  %159 = vperm.xlu1 %924, %v137_v17   ;;  %v48_v30 = vld [vmem:[%s1410_s0 + $0x90] sm:$0xff]  ;;  %vm543_vm1 = vcmask 523264  }
  0x26   :  { %v67_v25 = vld [vmem:[%s1410_s0 + $0x128] sm:$0xff]  ;;  %v134_v26 = vld [vmem:[%s1412_s2] sm:$0xff]  ;;  %v96_v28 = vpack.c.bf16 %v35_v23, %v34_v22  ;;  %v49_v31 = vld [vmem:[%s1410_s0 + $0x98] sm:$0xff] }
  0x27   :  { %v135_v27 = vld [vmem:[%s1412_s2 + $0x8] sm:$0xff]  ;;  %v112_v29 = vpack.c.bf16 %v67_v25, %v66_v24  ;;  %v80_v32 = vld [vmem:[%s1410_s0 + $0x190] sm:$0xff]  ;;  %v81_v33 = vld [vmem:[%s1410_s0 + $0x198] sm:$0xff]  ;;  %v103_v37 = vpack.c.bf16 %v49_v31, %v48_v30 }
  0x28   :  { %144 = vperm.xlu0 %923, %v134_v26   ;;  %v509_v34 = vld [vmem:[%s1414_s4] sm:$0xff]  ;;  %v510_v35 = vld [vmem:[%s1414_s4 + $0x8] sm:$0xff]  ;;  %v222_v36 = vsel %vm202_vm0, %v96_v28, 0  ;;  %v119_v39 = vpack.c.bf16 %v81_v33, %v80_v32  ;;  %v32_v40 = vld [vmem:[%s1410_s0 + $0x10] sm:$0xff] }
  0x29   :  { %865 = vmatpush3.bf16.xpose.msra.mxu0 %v225_v18  ;;  %149 = vperm.xlu1 %924, %v135_v27   ;;  %v270_v38 = vsel %vm202_vm0, %v112_v29, 0  ;;  %v33_v41 = vld [vmem:[%s1410_s0 + $0x18] sm:$0xff]  ;;  %v64_v42 = vld [vmem:[%s1410_s0 + $0x110] sm:$0xff]  ;;  %v46_v48 = vld [vmem:[%s1410_s0 + $0x80] sm:$0xff] }
  0x2a   :  { %889 = vmatpush3.bf16.xpose.msra.mxu1 %v273_v20  ;;  %909 = vmatprep.subr.msk.bf16.mxu0 %vm202_vm0, %v104_v19  ;;  %v65_v43 = vld [vmem:[%s1410_s0 + $0x118] sm:$0xff]  ;;  %v511_v44 = vld [vmem:[%s1414_s4 + $0x10] sm:$0xff]  ;;  %v95_v46 = vpack.c.bf16 %v33_v41, %v32_v40  ;;  %v47_v49 = vld [vmem:[%s1410_s0 + $0x88] sm:$0xff] }
  0x2b   :  { %917 = vmatprep.subr.msk.bf16.mxu1 %vm202_vm0, %v120_v21  ;;  %v512_v45 = vld [vmem:[%s1414_s4 + $0x18] sm:$0xff]  ;;  %v111_v47 = vpack.c.bf16 %v65_v43, %v64_v42  ;;  %v78_v50 = vld [vmem:[%s1410_s0 + $0x180] sm:$0xff]  ;;  %v79_v51 = vld [vmem:[%s1410_s0 + $0x188] sm:$0xff]  ;;  %v102_v55 = vpack.c.bf16 %v47_v49, %v46_v48 }
  0x2c   :  { %515 = vperm.xlu0 %923, %v509_v34   ;;  %v672_v52 = vld [vmem:[%s1415_s5] sm:$0xff]  ;;  %v673_v53 = vld [vmem:[%s1415_s5 + $0x8] sm:$0xff]  ;;  %v219_v54 = vsel %vm202_vm0, %v95_v46, 0  ;;  %v118_v58 = vpack.c.bf16 %v79_v51, %v78_v50  ;;  %v674_v63 = vld [vmem:[%s1415_s5 + $0x10] sm:$0xff] }
  0x2d   :  { %520 = vperm.xlu1 %924, %v510_v35   ;;  %v267_v56 = vsel %vm202_vm0, %v111_v47, 0  ;;  %v30_v59 = vld [vmem:[%s1410_s0] sm:$0xff]  ;;  %v31_v60 = vld [vmem:[%s1410_s0 + $0x8] sm:$0xff]  ;;  %v675_v0 = vld [vmem:[%s1415_s5 + $0x18] sm:$0xff] }
  0x2e   :  { %v62_v61 = vld [vmem:[%s1410_s0 + $0x100] sm:$0xff]  ;;  %v63_v62 = vld [vmem:[%s1410_s0 + $0x108] sm:$0xff]  ;;  %v94_v1 = vpack.c.bf16 %v31_v60, %v30_v59  ;;  %v927_v7 = vld [vmem:[%s1411_s1 + $0x10] sm:$0xff]  }
  0x2f   :  { %v110_v2 = vpack.c.bf16 %v63_v62, %v62_v61  ;;  %v748_v3 = vld [vmem:[#allocation2] sm:$0x1]  ;;  %v926_v6 = vld [vmem:[%s1411_s1 + $0x8] sm:$0xff]  }
  0x30   :  { %525 = vperm.xlu0 %923, %v511_v44   ;;  %v216_v4 = vsel %vm202_vm0, %v94_v1, 0 }
  0x31   :  { %867 = vmatpush3.bf16.xpose.msra.mxu0 %v222_v36  ;;  %530 = vperm.xlu1 %924, %v512_v45   ;;  %v264_v5 = vsel %vm202_vm0, %v110_v2, 0 }
  0x32   :  { %891 = vmatpush3.bf16.xpose.msra.mxu1 %v270_v38  ;;  %910 = vmatprep.subr.msk.bf16.mxu0 %vm202_vm0, %v103_v37 }
  0x33   :  { %918 = vmatprep.subr.msk.bf16.mxu1 %vm202_vm0, %v119_v39 }
  0x34   :  { %678 = vperm.xlu0 %923, %v672_v52  }
  0x35   :  { %683 = vperm.xlu1 %924, %v673_v53  }
  0x38   :  { %688 = vperm.xlu0 %923, %v674_v63  }
  0x39   :  { %869 = vmatpush3.bf16.xpose.msra.mxu0 %v219_v54  ;;  %693 = vperm.xlu1 %924, %v675_v0  }
  0x3a   :  { %893 = vmatpush3.bf16.xpose.msra.mxu1 %v267_v56  ;;  %911 = vmatprep.subr.msk.bf16.mxu0 %vm202_vm0, %v102_v55 }
  0x3b   :  { %919 = vmatprep.subr.msk.bf16.mxu1 %vm202_vm0, %v118_v58 }
  0x3c   :  { %751 = vperm.xlu0 %923, %v748_v3  }
  0x41   :  { %871 = vmatpush3.bf16.xpose.msra.mxu0 %v216_v4 }
  0x42   :  { %895 = vmatpush3.bf16.xpose.msra.mxu1 %v264_v5 }
  0x48   :  { %873 = vmatmul.mubr.msk.bf16.vlgmr.msra.gmra.mxu0 %vm202_vm0, %v1135_v57 }
  0x49   :  { %897 = vmatmul.mubr.msk.bf16.vlgmr.msra.gmra.mxu1 %vm202_vm0, %v1135_v57  ;;  %874 = vmatprep.mubr.msk.bf16.mxu0 %vm202_vm0, %v926_v6  ;;  %v928_v57 = vld [vmem:[%s1411_s1 + $0x18] sm:$0xff]  }
  0x4a   :  { %898 = vmatprep.mubr.msk.bf16.mxu1 %vm202_vm0, %v926_v6 }
  0x50   :  { %875 = vmatmul.mubr.msk.bf16.gmra.mxu0 %vm202_vm0, %v926_v6 }
  0x51   :  { %899 = vmatmul.mubr.msk.bf16.gmra.mxu1 %vm202_vm0, %v926_v6  ;;  %876 = vmatprep.mubr.msk.bf16.mxu0 %vm202_vm0, %v927_v7 }
  0x52   :  { %900 = vmatprep.mubr.msk.bf16.mxu1 %vm202_vm0, %v927_v7 }
  0x58   :  { %877 = vmatmul.mubr.msk.bf16.gmra.mxu0 %vm202_vm0, %v927_v7 }
  0x59   :  { %901 = vmatmul.mubr.msk.bf16.gmra.mxu1 %vm202_vm0, %v927_v7  ;;  %878 = vmatprep.mubr.msk.bf16.mxu0 %vm202_vm0, %v928_v57 }
  0x5a   :  { %902 = vmatprep.mubr.msk.bf16.mxu1 %vm202_vm0, %v928_v57 }
  0x60   :  { %879 = vmatmul.mubr.msk.bf16.gmra.mxu0 %vm202_vm0, %v928_v57 }
  0x61   :  { %903 = vmatmul.mubr.msk.bf16.gmra.mxu1 %vm202_vm0, %v928_v57  ;;  %582 = vmatprep.mubr.bf16.mxu0 %v969_v8 }
  0x62   :  { %635 = vmatprep.mubr.bf16.mxu1 %v969_v8 }
  0x8b   :  { %v175_v16 = vpop.permute.xlu0 %174  ;;  %v1333_v18 = vpop.permute.xlu1 %164 }
  0x8f   :  { %v180_v24 = vpop.permute.xlu0 %179  ;;  %v170_v26 = vpop.permute.xlu1 %169 }
  0x9f   :  { %v1339_v32 = vpop.permute.xlu0 %154 }
  0xa0   :  { %v160_v34 = vpop.permute.xlu1 %159 }
  0xa3   :  { %v1341_v40 = vpop.permute.xlu0 %144 }
  0xa4   :  { %v1349_v44 = vpop.permute.xlu1 %149 }
 0x108   :  { %v1325_v9 = vpop.f32.mrf.mxu0 }
 0x109   :  { %v1327_v10 = vpop.f32.mrf.mxu1 }
 0x10a   :  { %v347_v11 = vpop.f32.mrf.mxu0 }
 0x10b   :  { %v420_v12 = vpop.f32.mrf.mxu1  ;;  %v1344_v42 = vadd.f32 %v347_v11, %v1341_v40 }
 0x10c   :  { %v1329_v13 = vpop.f32.mrf.mxu0  ;;  %v1347_v43 = vadd.f32 %v420_v12, %v1341_v40 }
 0x10d   :  { %v1331_v14 = vpop.f32.mrf.mxu1 }
 0x10e   :  { %v351_v15 = vpop.f32.mrf.mxu0 }
 0x10f   :  { %v424_v17 = vpop.f32.mrf.mxu1  ;;  %v1352_v46 = vadd.f32 %v351_v15, %v1349_v44 }
 0x110   :  { %v1335_v19 = vpop.f32.mrf.mxu0  ;;  %v1355_v47 = vadd.f32 %v424_v17, %v1349_v44 }
 0x111   :  { %v1337_v20 = vpop.f32.mrf.mxu1 }
 0x112   :  { %v357_v21 = vpop.f32.mrf.mxu0 }
 0x113   :  { %v430_v22 = vpop.f32.mrf.mxu1  ;;  %v1358_v48 = vadd.f32 %v357_v21, %v1339_v32 }
 0x114   :  { %v359_v23 = vpop.f32.mrf.mxu0  ;;  %v1361_v49 = vadd.f32 %v430_v22, %v1339_v32 }
 0x115   :  { %v432_v25 = vpop.f32.mrf.mxu1  ;;  %v1363_v51 = vadd.f32 %v359_v23, %v160_v34 }
 0x116   :  { %v361_v27 = vpop.f32.mrf.mxu0  ;;  %v1365_v52 = vadd.f32 %v432_v25, %v160_v34 }
 0x117   :  { %v434_v28 = vpop.f32.mrf.mxu1  ;;  %v1367_v53 = vadd.f32 %v361_v27, %v160_v34 }
 0x118   :  { %v365_v29 = vpop.f32.mrf.mxu0  ;;  %v1369_v54 = vadd.f32 %v434_v28, %v160_v34 }
 0x119   :  { %v438_v30 = vpop.f32.mrf.mxu1  ;;  %v366_v56 = vadd.f32 %v365_v29, %v1333_v18 }
 0x11a   :  { %v367_v31 = vpop.f32.mrf.mxu0  ;;  %v439_v34 = vadd.f32 %v438_v30, %v1333_v18  ;;  %v350_v30 = vadd.f32 %v1329_v13, %v1349_v44  ;;  %v471_v13 = vmax.f32 %v1365_v52, 0.0 }
 0x11b   :  { %v440_v33 = vpop.f32.mrf.mxu1  ;;  %v368_v3 = vadd.f32 %v367_v31, %v1333_v18 }
 0x11c   :  { %v369_v35 = vpop.f32.mrf.mxu0  ;;  %v441_v4 = vadd.f32 %v440_v33, %v1333_v18 }
 0x11d   :  { %v442_v36 = vpop.f32.mrf.mxu1  ;;  %v370_v57 = vadd.f32 %v369_v35, %v170_v26  ;;  %v474_v31 = vmax.f32 %v368_v3, 0.0 }
 0x11e   :  { %v371_v37 = vpop.f32.mrf.mxu0  ;;  %v443_v11 = vadd.f32 %v442_v36, %v170_v26 }
 0x11f   :  { %v444_v38 = vpop.f32.mrf.mxu1  ;;  %v372_v58 = vadd.f32 %v371_v37, %v170_v26 }
 0x120   :  { %v375_v39 = vpop.f32.mrf.mxu0  ;;  %v445_v62 = vadd.f32 %v444_v38, %v170_v26  ;;  %v477_v38 = vmax.f32 %v370_v57, 0.0  ;;  %v470_v26 = vmax.f32 %v1367_v53, 0.0  ;;  %v466_v53 = vmax.f32 %v1358_v48, 0.0 }
 0x121   :  { %v448_v41 = vpop.f32.mrf.mxu1  ;;  %v376_v63 = vadd.f32 %v375_v39, %v175_v16  ;;  %v478_v17 = vmax.f32 %v372_v58, 0.0  ;;  %v429_v58 = vadd.f32 %v1337_v20, %v1339_v32  ;;  %v464_v48 = vmax.f32 %v1355_v47, 0.0 }
 0x122   :  { %v377_v45 = vpop.f32.mrf.mxu0  ;;  %v449_v5 = vadd.f32 %v448_v41, %v175_v16  ;;  %v480_v25 = vmax.f32 %v445_v62, 0.0  ;;  %v498_v62 = vpack.c.bf16 %v470_v26, %v466_v53 }
 0x123   :  { %v450_v50 = vpop.f32.mrf.mxu1  ;;  %v378_v59 = vadd.f32 %v377_v45, %v175_v16  ;;  %v481_v27 = vmax.f32 %v376_v63, 0.0  ;;  %v502_v36 = vpack.c.bf16 %v478_v17, %v474_v31  ;;  %v356_v45 = vadd.f32 %v1335_v19, %v1339_v32 }
 0x124   :  { %v379_v55 = vpop.f32.mrf.mxu0  ;;  %v451_v0 = vadd.f32 %v450_v50, %v175_v16  ;;  %v483_v37 = vmax.f32 %v449_v5, 0.0  ;;  %v476_v16 = vmax.f32 %v441_v4, 0.0  ;;  %v472_v50 = vmax.f32 %v1369_v54, 0.0  ;;  %v516_v5 = vpop.permute.xlu0 %515 }
 0x125   :  { %v380_v60 = vadd.f32 %v379_v55, %v180_v24  ;;  %v452_v61 = vpop.f32.mrf.mxu1  ;;  %v482_v21 = vmax.f32 %v378_v59, 0.0  ;;  %v473_v55 = vmax.f32 %v366_v56, 0.0  ;;  %v475_v59 = vmax.f32 %v439_v34, 0.0 }
 0x126   :  { %v453_v1 = vadd.f32 %v452_v61, %v180_v24  ;;  %v381_v2 = vpop.f32.mrf.mxu0  ;;  %v484_v28 = vmax.f32 %v451_v0, 0.0  ;;  %v504_v18 = vpack.c.bf16 %v480_v25, %v476_v16  ;;  %v423_v19 = vadd.f32 %v1331_v14, %v1349_v44 }
 0x127   :  { %v382_v6 = vadd.f32 %v381_v2, %v180_v24  ;;  %v454_v7 = vpop.f32.mrf.mxu1  ;;  %v485_v12 = vmax.f32 %v380_v60, 0.0  ;;  %v468_v54 = vmax.f32 %v1361_v49, 0.0  ;;  %v469_v56 = vmax.f32 %v1363_v51, 0.0 }
 0x128   :  { %v455_v15 = vadd.f32 %v454_v7, %v180_v24  ;;  %v487_v22 = vmax.f32 %v453_v1, 0.0  ;;  %v479_v24 = vmax.f32 %v443_v11, 0.0  ;;  %v501_v60 = vpack.c.bf16 %v477_v38, %v473_v55  ;;  %v526_v7 = vpop.permute.xlu0 %525 }
 0x129   :  { %v486_v23 = vmax.f32 %v382_v6, 0.0  ;;  %v505_v39 = vpack.c.bf16 %v485_v12, %v481_v27  ;;  %v462_v61 = vmax.f32 %v1352_v46, 0.0  ;;  %v346_v32 = vadd.f32 %v1325_v9, %v1341_v40  ;;  %v521_v6 = vpop.permute.xlu1 %520 }
 0x12a   :  { %v488_v29 = vmax.f32 %v455_v15, 0.0  ;;  %v507_v41 = vpack.c.bf16 %v487_v22, %v483_v37  ;;  %v503_v20 = vpack.c.bf16 %v479_v24, %v475_v59  ;;  %v465_v63 = vmax.f32 %v356_v45, 0.0 }
 0x12b   :  { %v506_v33 = vpack.c.bf16 %v486_v23, %v482_v21  ;;  %v500_v0 = vpack.c.bf16 %v472_v50, %v468_v54  ;;  %v419_v14 = vadd.f32 %v1327_v10, %v1341_v40  ;;  %v458_v44 = vmax.f32 %v1344_v42, 0.0  ;;  %v929_v42 = vld [vmem:[%s1413_s3] sm:$0xff]  }
 0x12c   :  { %v508_v35 = vpack.c.bf16 %v488_v29, %v484_v28  ;;  %v467_v49 = vmax.f32 %v429_v58, 0.0  ;;  %v460_v46 = vmax.f32 %v1347_v43, 0.0  ;;  %v461_v51 = vmax.f32 %v350_v30, 0.0  ;;  %v930_v43 = vld [vmem:[%s1413_s3 + $0x8] sm:$0xff]   ;;  %v679_v29 = vpop.permute.xlu0 %678  ;;  %s971_s3 = smov [#allocation3]  }
 0x12d   :  { %558 = vmatprep.subr.bf16.mxu0 %v506_v33  ;;  %v497_v52 = vpack.c.bf16 %v469_v56, %v465_v63  ;;  %v463_v1 = vmax.f32 %v423_v19, 0.0  ;;  %v494_v9 = vpack.c.bf16 %v462_v61, %v458_v44  ;;  %v457_v47 = vmax.f32 %v346_v32, 0.0  ;;  %v531_v23 = vpop.permute.xlu1 %530  ;;  %s826_s24 = sshll.u32 %s971_s3, 4  ;;  %s827_s24 = int_to_ptr.vmem [resolvable:$true] %s826_s24 }
 0x12e   :  { %611 = vmatprep.subr.bf16.mxu1 %v508_v35  ;;  %559 = vmatpush1.bf16.msra.mxu0 %v505_v39  ;;  %v499_v2 = vpack.c.bf16 %v471_v13, %v467_v49  ;;  %v496_v3 = vpack.c.bf16 %v464_v48, %v460_v46  ;;  %v459_v4 = vmax.f32 %v419_v14, 0.0  ;;  %s947_s4 = scalar_lea.vmem %s827_s24, 64  ;;  %p952_p1 = scmp.lt.s32.totalorder %s827_s24, %s827_s24 }
 0x12f   :  { %612 = vmatpush1.bf16.msra.mxu1 %v507_v41  ;;  %560 = vmatprep.subr.bf16.mxu0 %v502_v36  ;;  %v493_v10 = vpack.c.bf16 %v461_v51, %v457_v47  ;;  %p948_p0 = scmp.ne.s32.totalorder %s827_s24, %s947_s4  ;;  %p953_p2 = scmp.lt.s32.totalorder %s947_s4, %s947_s4 }
 0x130   :  { %613 = vmatprep.subr.bf16.mxu1 %v504_v18  ;;  %v495_v40 = vpack.c.bf16 %v463_v1, %v459_v4 }
 0x131   :  { %v684_v18 = vpop.permute.xlu1 %683  ;;  %p954_p3 = por %p953_p2, %p952_p1 }
 0x132   :  { %561 = vmatpush1.bf16.msra.mxu0 %v501_v60 }
 0x133   :  { %614 = vmatpush1.bf16.msra.mxu1 %v503_v20  ;;  %562 = vmatprep.subr.bf16.mxu0 %v498_v62  ;;  %v689_v62 = vpop.permute.xlu0 %688  ;;  %p955_p4 = pnand %p954_p3, %p948_p0 }
 0x134   :  { %615 = vmatprep.subr.bf16.mxu1 %v500_v0 }
 0x136   :  { %563 = vmatpush1.bf16.msra.mxu0 %v497_v52 }
 0x137   :  { %616 = vmatpush1.bf16.msra.mxu1 %v499_v2  ;;  %564 = vmatprep.subr.bf16.mxu0 %v494_v9 }
 0x138   :  { %617 = vmatprep.subr.bf16.mxu1 %v496_v3 }
 0x13a   :  { %565 = vmatpush1.bf16.msra.mxu0 %v493_v10 }
 0x13b   :  { %618 = vmatpush1.bf16.msra.mxu1 %v495_v40 }
 0x13d   :  { %848 = vmatmul.mubr.msk.bf16.vlgmr.msra.gmra.mxu0 %vm543_vm1, %v929_v42 }
 0x13e   :  { %850 = vmatmul.mubr.msk.bf16.vlgmr.msra.gmra.mxu1 %vm543_vm1, %v929_v42  ;;  %592 = vmatprep.mubr.bf16.mxu0 %v969_v8 }
 0x13f   :  { %645 = vmatprep.mubr.bf16.mxu1 %v969_v8 }
 0x145   :  { %849 = vmatmul.mubr.msk.bf16.gmra.mxu0 %vm543_vm1, %v930_v43 }
 0x146   :  { %851 = vmatmul.mubr.msk.bf16.gmra.mxu1 %vm543_vm1, %v930_v43  ;;  %v694_v43 = vpop.permute.xlu1 %693 }
 0x1fd   :  { %v584_v57 = vpop.f32.mrf.mxu0 }
 0x1fe   :  { %v637_v11 = vpop.f32.mrf.mxu1  ;;  %v585_v12 = vadd.f32 %v584_v57, %v516_v5 }
 0x1ff   :  { %v638_v15 = vadd.f32 %v637_v11, %v516_v5  ;;  %v586_v17 = vpop.f32.mrf.mxu0 }
 0x200   :  { %v587_v21 = vadd.f32 %v586_v17, %v516_v5  ;;  %v639_v22 = vpop.f32.mrf.mxu1  ;;  %v656_v34 = vmax.f32 %v585_v12, 0.0 }
 0x201   :  { %v640_v25 = vadd.f32 %v639_v22, %v516_v5  ;;  %v588_v27 = vpop.f32.mrf.mxu0  ;;  %v658_v31 = vmax.f32 %v638_v15, 0.0 }
 0x202   :  { %v589_v8 = vadd.f32 %v588_v27, %v521_v6  ;;  %v641_v28 = vpop.f32.mrf.mxu1  ;;  %v657_v16 = vmax.f32 %v587_v21, 0.0  ;;  %v696_v30 = vmul.f32 %v679_v29, %v656_v34 }
 0x203   :  { %v642_v37 = vadd.f32 %v641_v28, %v521_v6  ;;  %v590_v33 = vpop.f32.mrf.mxu0  ;;  %v659_v26 = vmax.f32 %v640_v25, 0.0  ;;  %v698_v58 = vmul.f32 %v679_v29, %v658_v31 }
 0x204   :  { %v660_v38 = vmax.f32 %v589_v8, 0.0  ;;  %v591_v39 = vadd.f32 %v590_v33, %v521_v6  ;;  %v643_v35 = vpop.f32.mrf.mxu1  ;;  %v697_v54 = vmul.f32 %v679_v29, %v657_v16  ;;  %v754_v8 = vlaneseq }
 0x205   :  { %v662_v24 = vmax.f32 %v642_v37, 0.0  ;;  %v644_v36 = vadd.f32 %v643_v35, %v521_v6  ;;  %v594_v41 = vpop.f32.mrf.mxu0  ;;  %v699_v20 = vmul.f32 %v679_v29, %v659_v26 }
 0x206   :  { %v661_v45 = vmax.f32 %v591_v39, 0.0  ;;  %v595_v50 = vadd.f32 %v594_v41, %v526_v7  ;;  %v647_v55 = vpop.f32.mrf.mxu1  ;;  %v700_v56 = vmul.f32 %v684_v18, %v660_v38  ;;  %vm817_vm2 = vcmp.lt.s32.totalorder %v754_v8, 512 }
 0x207   :  { %v663_v53 = vmax.f32 %v644_v36, 0.0  ;;  %v648_v59 = vadd.f32 %v647_v55, %v526_v7  ;;  %v596_v19 = vpop.f32.mrf.mxu0  ;;  %v702_v32 = vmul.f32 %v684_v18, %v662_v24 }
 0x208   :  { %v664_v60 = vmax.f32 %v595_v50, 0.0  ;;  %v597_v61 = vadd.f32 %v596_v19, %v526_v7  ;;  %v649_v13 = vpop.f32.mrf.mxu1  ;;  %v701_v14 = vmul.f32 %v684_v18, %v661_v45  ;;  %v712_v3 = vadd.f32 %v700_v56, %v696_v30 }
 0x209   :  { %v666_v48 = vmax.f32 %v648_v59, 0.0  ;;  %v650_v63 = vadd.f32 %v649_v13, %v526_v7  ;;  %v598_v0 = vpop.f32.mrf.mxu0  ;;  %v703_v52 = vmul.f32 %v684_v18, %v663_v53  ;;  %v730_v5 = vadd.f32 %v702_v32, %v698_v58  ;;  %v752_v59 = vpop.permute.xlu0 %751 }
 0x20a   :  { %v704_v44 = vmul.f32 %v689_v62, %v664_v60  ;;  %v665_v49 = vmax.f32 %v597_v61, 0.0  ;;  %v599_v46 = vadd.f32 %v598_v0, %v531_v23  ;;  %v651_v51 = vpop.f32.mrf.mxu1  ;;  %v721_v11 = vadd.f32 %v701_v14, %v697_v54 }
 0x20b   :  { %v706_v1 = vmul.f32 %v689_v62, %v666_v48  ;;  %v667_v9 = vmax.f32 %v650_v63, 0.0  ;;  %v652_v2 = vadd.f32 %v651_v51, %v531_v23  ;;  %v600_v47 = vpop.f32.mrf.mxu0  ;;  %v739_v21 = vadd.f32 %v703_v52, %v699_v20 }
 0x20c   :  { %v705_v4 = vmul.f32 %v689_v62, %v665_v49  ;;  %v668_v10 = vmax.f32 %v599_v46, 0.0  ;;  %v601_v40 = vadd.f32 %v600_v47, %v531_v23  ;;  %v653_v42 = vpop.f32.mrf.mxu1  ;;  %v713_v12 = vadd.f32 %v712_v3, %v704_v44 }
 0x20d   :  { %v707_v6 = vmul.f32 %v689_v62, %v667_v9  ;;  %v670_v7 = vmax.f32 %v652_v2, 0.0  ;;  %v654_v57 = vadd.f32 %v653_v42, %v531_v23  ;;  %v731_v22 = vadd.f32 %v730_v5, %v706_v1 }
 0x20e   :  { %v708_v15 = vmul.f32 %v694_v43, %v668_v10  ;;  %v669_v17 = vmax.f32 %v601_v40, 0.0  ;;  %v722_v28 = vadd.f32 %v721_v11, %v705_v4  ;;  %v755_v23 = vshrl.u32 %v754_v8, 7 }
 0x20f   :  { %v710_v25 = vmul.f32 %v694_v43, %v670_v7  ;;  %v671_v27 = vmax.f32 %v654_v57, 0.0  ;;  %v740_v31 = vadd.f32 %v739_v21, %v707_v6  ;;  %v970_v6 = vmov 1966171168  }
 0x210   :  { %v714_v29 = vadd.f32 %v713_v12, %v708_v15  ;;  %v709_v34 = vmul.f32 %v694_v43, %v669_v17  ;;  %v756_v30 = vsub.s32 0, %v755_v23  ;;  %v793_v7 = vunpack.c.l.s4 %v970_v6 }
 0x211   :  { %v732_v37 = vadd.f32 %v731_v22, %v710_v25  ;;  %v711_v33 = vmul.f32 %v694_v43, %v671_v27 }
 0x212   :  { %v715_v16 = vrot.slane %v714_v29, 4  ;;  %v723_v38 = vadd.f32 %v722_v28, %v709_v34  ;;  %v757_v62 = vrot.slane %v752_v59, %v756_v30  ;;  %v794_v57 = vunpack.c.0.s8 %v793_v7 }
 0x213   :  { %v733_v39 = vrot.slane %v732_v37, 4  ;;  %v741_v35 = vadd.f32 %v740_v31, %v711_v33 }
 0x214   :  { %v716_v26 = vadd.f32 %v715_v16, %v714_v29  ;;  %v724_v24 = vrot.slane %v723_v38, 4  ;;  %v797_v15 = vsub.s32 %v794_v57, %v755_v23 }
 0x215   :  { %v734_v36 = vadd.f32 %v733_v39, %v732_v37  ;;  %v742_v41 = vrot.slane %v741_v35, 4 }
 0x216   :  { %v717_v45 = vrot.slane %v716_v26, 2  ;;  %v725_v50 = vadd.f32 %v724_v24, %v723_v38 }
 0x217   :  { %v735_v55 = vrot.slane %v734_v36, 2  ;;  %v743_v18 = vadd.f32 %v742_v41, %v741_v35 }
 0x218   :  { %v718_v58 = vadd.f32 %v717_v45, %v716_v26  ;;  %v726_v53 = vrot.slane %v725_v50, 2 }
 0x219   :  { %v736_v19 = vadd.f32 %v735_v55, %v734_v36  ;;  %v744_v54 = vrot.slane %v743_v18, 2 }
 0x21a   :  { %v719_v56 = vrot.slane %v718_v58, 1  ;;  %v727_v60 = vadd.f32 %v726_v53, %v725_v50 }
 0x21b   :  { %v737_v61 = vrot.slane %v736_v19, 1  ;;  %v745_v13 = vadd.f32 %v744_v54, %v743_v18 }
 0x21c   :  { %v720_v20 = vadd.f32 %v719_v56, %v718_v58  ;;  %v728_v32 = vrot.slane %v727_v60, 1 }
 0x21d   :  { %v738_v48 = vadd.f32 %v737_v61, %v736_v19  ;;  %v746_v63 = vrot.slane %v745_v13, 1 }
 0x21e   :  { %v758_v0 = vadd.f32 %v757_v62, %v720_v20  ;;  %v729_v14 = vadd.f32 %v728_v32, %v727_v60 }
 0x21f   :  { %v760_v44 = vadd.f32 %v757_v62, %v738_v48  ;;  %v747_v49 = vadd.f32 %v746_v63, %v745_v13 }
 0x220   :  { %v852_v46 = vmul.f32 -1.442695, %v758_v0  ;;  %v759_v51 = vadd.f32 %v757_v62, %v729_v14 }
 0x221   :  { %v854_v52 = vmul.f32 -1.442695, %v760_v44  ;;  %v761_v1 = vadd.f32 %v757_v62, %v747_v49 }
 0x222   :  { %931 = vpow2.f32 %v852_v46  ;;  %v853_v9 = vmul.f32 -1.442695, %v759_v51 }
 0x223   :  { %933 = vpow2.f32 %v854_v52  ;;  %v855_v2 = vmul.f32 -1.442695, %v761_v1 }
 0x224   :  { %935 = vpow2.f32 %v853_v9 }
 0x225   :  { %937 = vpow2.f32 %v855_v2 }
 0x22f   :  { %v932_v47 = vpop.eup %931 }
 0x230   :  { %v934_v3 = vpop.eup %933  ;;  %v774_v4 = vadd.f32 1.0, %v932_v47 }
 0x231   :  { %v936_v10 = vpop.eup %935  ;;  %v776_v40 = vadd.f32 1.0, %v934_v3 }
 0x232   :  { %v938_v42 = vpop.eup %937  ;;  %939 = vrcp.f32 %v774_v4  ;;  %v775_v43 = vadd.f32 1.0, %v936_v10 }
 0x233   :  { %941 = vrcp.f32 %v776_v40  ;;  %v777_v5 = vadd.f32 1.0, %v938_v42 }
 0x234   :  { %943 = vrcp.f32 %v775_v43 }
 0x235   :  { %945 = vrcp.f32 %v777_v5 }
 0x23f   :  { %v940_v11 = vpop.eup %939 }
 0x240   :  { %v942_v12 = vpop.eup %941 }
 0x241   :  { %v944_v17 = vpop.eup %943 }
 0x242   :  { %v946_v21 = vpop.eup %945  ;;  %v790_v22 = vcombine.low %v940_v11, %v944_v17 }
 0x243   :  { %v791_v25 = vcombine.low %v942_v12, %v946_v21 }
 0x244   :  { %v798_v27 = vrot.slane %v790_v22, %v797_v15 }
 0x245   :  { %v805_v28 = vrot.slane %v791_v25, %v797_v15 }
 0x247   :  { %v806_v29 = vcombine.low %v798_v27, %v805_v28 }
 0x249   :  { %v813_v34 = vrot.slane %v806_v29, %v797_v15 }
 0x24b   :  { %819 = vst.msk [vmem:[#allocation3] sm:$0xf] %vm817_vm2, %v813_v34 }
 0x24c   :  { %958 = shalt.err (!%p955_p4)
}
 0x24d   :  { %829 = dma.vmem_to_hbm [thread:$0]  %s827_s24, 64, %s1417_s7, [#allocation4]  }
 0x24e   :  { %967 = dma.done.wait [#allocation4], 64  }
 0x24f   :  { %968 = vsyncadd [#allocation4], 4294967232 }
 0x250   :  { %833 = vsyncpa [#allocation4], 1 }

</bundles_post_ra>
